<compile_context>
chip_gen: v7x
topology: tpu7x:2x2x1
jax: 0.10.0
libtpu: 0.0.40
codegen_flags: <defaults>
</compile_context>

<pallas_src>
import jax
import jax.numpy as jnp
import numpy as np
from jax.experimental import pallas as pl
from jax.experimental.pallas import tpu as pltpu


def _comp_sp_kernel(h_ref, roi_ref, ctx_ref,
                    wh_ref, bh_ref, wv_ref, bv_ref, wa_ref, ba_ref,
                    o_ref):
    # Per-grid-step blocks:
    #   h_ref   (TB, R)      roi_ref (TB, L, R)   ctx_ref (TB, R)
    #   wh_ref  (R, A)       bh_ref  (1, A)
    #   wv_ref  (R, A)       bv_ref  (1, A)
    #   wa_ref  (1, A)       ba_ref  (1,)  in SMEM
    #   o_ref   (TB, R)
    TB, L, R = roi_ref.shape
    A = wh_ref.shape[1]

    h = h_ref[...]                                   # (TB, R)
    roi = roi_ref[...]                               # (TB, L, R)
    ctx = ctx_ref[...]                               # (TB, R)

    # ComputeRelation: feats = context_feat.unsqueeze(1) - roi_feats
    feats = ctx[:, None, :] - roi                    # (TB, L, R)

    # wv over all TB*L rows in one MXU call; wh over TB rows.
    wv_out = jnp.dot(feats.reshape(TB * L, R), wv_ref[...],
                     preferred_element_type=jnp.float32) + bv_ref[...]   # (TB*L, A)
    wh_out = jnp.dot(h, wh_ref[...],
                     preferred_element_type=jnp.float32) + bh_ref[...]   # (TB, A)

    dot = wv_out.reshape(TB, L, A) + wh_out[:, None, :]                  # (TB, L, A)
    t = jnp.tanh(dot)

    # Score: VPU multiply + lane reduce (no N=1 matmul); lane-major (TB, L).
    score = jnp.sum(t * wa_ref[...], axis=-1) + ba_ref[0]                # (TB, L)

    # Softmax over the region axis (last axis == lanes).
    m = jnp.max(score, axis=-1, keepdims=True)                           # (TB, 1)
    e = jnp.exp(score - m)                                               # (TB, L)
    w = e * pl.reciprocal(jnp.sum(e, axis=-1, keepdims=True), approx=True)

    # bmm(weight.unsqueeze(1), feats).squeeze(1): weighted pooling over regions.
    comp = jnp.sum(w[:, :, None] * feats, axis=1)                        # (TB, R)

    o_ref[...] = comp.astype(o_ref.dtype)


def _pick_block_batch(B, cap=128):
    """Rows per grid step: single step for small B; otherwise a sublane-dense
    (multiple-of-8) divisor of B, preferring >=2 grid steps so both v7x
    TensorCores get work under dimension_semantics=('parallel',)."""
    if B < 16:
        return B
    limit = min(cap, B // 2)
    tb = limit - (limit % 8)
    while tb >= 8:
        if B % tb == 0:
            return tb
        tb -= 8
    return B if B <= cap else 8


def comp_sp(h, roi_feats, context_feat, params, *, block_batch=None):
    """Pallas implementation of CompSP.forward (att_masks=None)."""
    B, L, R = roi_feats.shape
    A = params["wh_w"].shape[1]

    TB = _pick_block_batch(B) if block_batch is None else block_batch
    assert B % TB == 0, f"block_batch {TB} must divide batch {B}"
    grid = (B // TB,)

    wa_row = params["wa_w"].reshape(1, A)   # (A, 1) -> lane-dense (1, A) row
    ba = params["wa_b"].reshape(1)          # scalar bias -> SMEM

    # TODO(synk): when scaling R/A well beyond the toy 32 (e.g. 512-2048), set
    # pltpu.CompilerParams(vmem_limit_bytes=...) and size TB against v7x's
    # 64 MiB VMEM (32 MiB default scoped), and cast matmul inputs to bf16.
    out = pl.pallas_call(
        _comp_sp_kernel,
        out_shape=jax.ShapeDtypeStruct((B, R), jnp.float32),
        grid_spec=pl.GridSpec(
            grid=grid,
            in_specs=[
                pl.BlockSpec((TB, R), lambda b: (b, 0)),        # h
                pl.BlockSpec((TB, L, R), lambda b: (b, 0, 0)),  # roi_feats
                pl.BlockSpec((TB, R), lambda b: (b, 0)),        # context_feat
                pl.BlockSpec((R, A), lambda b: (0, 0)),         # wh weight
                pl.BlockSpec((1, A), lambda b: (0, 0)),         # wh bias
                pl.BlockSpec((R, A), lambda b: (0, 0)),         # wv weight
                pl.BlockSpec((1, A), lambda b: (0, 0)),         # wv bias
                pl.BlockSpec((1, A), lambda b: (0, 0)),         # wa row
                pl.BlockSpec(memory_space=pltpu.MemorySpace.SMEM),  # wa bias scalar
            ],
            out_specs=pl.BlockSpec((TB, R), lambda b: (b, 0)),
        ),
        compiler_params=pltpu.CompilerParams(
            dimension_semantics=("parallel",)),
    )(h, roi_feats, context_feat,
      params["wh_w"], params["wh_b"],
      params["wv_w"], params["wv_b"],
      wa_row, ba)
    return out


def comp_sp_reference(h, roi_feats, context_feat, params):
    """Plain-JAX reference of the PyTorch CompSP.forward (att_masks=None)."""
    feats = context_feat[:, None, :] - roi_feats                        # (B, L, R)
    feats_ = feats @ params["wv_w"] + params["wv_b"]                    # (B, L, A)
    wh_h = h @ params["wh_w"] + params["wh_b"]                          # (B, A)
    dot = wh_h[:, None, :] + feats_                                     # (B, L, A)
    score = (jnp.tanh(dot) @ params["wa_w"] + params["wa_b"])[..., 0]   # (B, L)
    weight = jax.nn.softmax(score, axis=1)                              # (B, L)
    return jnp.einsum("bl,blr->br", weight, feats)                      # (B, R)


def make_params(key, rnn_size, att_hid_size):
    """Deterministic PyTorch-Linear-style init (uniform +/- 1/sqrt(fan_in))."""
    ks = jax.random.split(key, 6)

    def lin(kw, kb, fan_in, fan_out):
        bound = 1.0 / np.sqrt(fan_in)
        w = jax.random.uniform(kw, (fan_in, fan_out), jnp.float32, -bound, bound)
        b = jax.random.uniform(kb, (1, fan_out), jnp.float32, -bound, bound)
        return w, b

    wh_w, wh_b = lin(ks[0], ks[1], rnn_size, att_hid_size)
    wv_w, wv_b = lin(ks[2], ks[3], rnn_size, att_hid_size)
    wa_w, wa_b = lin(ks[4], ks[5], att_hid_size, 1)
    return {"wh_w": wh_w, "wh_b": wh_b,
            "wv_w": wv_w, "wv_b": wv_b,
            "wa_w": wa_w, "wa_b": wa_b}


if __name__ == "__main__":
    # Small shapes implied by the forward: batch=2, regions L=8, rnn_size=32, att_hid_size=32
    B, L, R, A = 2, 8, 32, 32
    key = jax.random.PRNGKey(0)
    k_h, k_roi, k_ctx, k_p = jax.random.split(key, 4)

    h = jax.random.normal(k_h, (B, R), jnp.float32)
    roi_feats = jax.random.normal(k_roi, (B, L, R), jnp.float32)
    context_feat = jax.random.normal(k_ctx, (B, R), jnp.float32)
    params = make_params(k_p, R, A)

    out = comp_sp(h, roi_feats, context_feat, params)
    out = jax.block_until_ready(out)

    ref = comp_sp_reference(h, roi_feats, context_feat, params)
    # Tolerance covers the approx-reciprocal softmax denominator.
    np.testing.assert_allclose(np.asarray(out), np.asarray(ref), rtol=2e-3, atol=2e-3)

    print("KERNEL_OK")
</pallas_src>

<mosaic_0001>
module attributes {stable_mosaic.version = 11 : i64} {
  func.func @_comp_sp_kernel(%arg0: i32, %arg1: memref<2x32xf32, #tpu.memory_space<vmem>>, %arg2: memref<2x8x32xf32, #tpu.memory_space<vmem>>, %arg3: memref<2x32xf32, #tpu.memory_space<vmem>>, %arg4: memref<32x32xf32, #tpu.memory_space<vmem>>, %arg5: memref<1x32xf32, #tpu.memory_space<vmem>>, %arg6: memref<32x32xf32, #tpu.memory_space<vmem>>, %arg7: memref<1x32xf32, #tpu.memory_space<vmem>>, %arg8: memref<1x32xf32, #tpu.memory_space<vmem>>, %arg9: memref<1xf32, #tpu.memory_space<smem>>, %arg10: memref<2x32xf32, #tpu.memory_space<vmem>>) attributes {dimension_semantics = [#tpu.dimension_semantics<parallel>], iteration_bounds = array<i64: 1>, scalar_prefetch = 0 : i64, scratch_operands = 0 : i64, tpu.core_type = #tpu.core_type<tc>, window_params = [{transform_indices = @transform_0, window_bounds = array<i64: 2, 32>}, {transform_indices = @transform_1, window_bounds = array<i64: 2, 8, 32>}, {transform_indices = @transform_2, window_bounds = array<i64: 2, 32>}, {pipeline_mode = #tpu.pipeline_mode<synchronous>, transform_indices = @transform_3, window_bounds = array<i64: 32, 32>}, {pipeline_mode = #tpu.pipeline_mode<synchronous>, transform_indices = @transform_4, window_bounds = array<i64: 1, 32>}, {pipeline_mode = #tpu.pipeline_mode<synchronous>, transform_indices = @transform_5, window_bounds = array<i64: 32, 32>}, {pipeline_mode = #tpu.pipeline_mode<synchronous>, transform_indices = @transform_6, window_bounds = array<i64: 1, 32>}, {pipeline_mode = #tpu.pipeline_mode<synchronous>, transform_indices = @transform_7, window_bounds = array<i64: 1, 32>}, {transform_indices = @transform_8, window_bounds = array<i64: 1>}, {transform_indices = @transform_9, window_bounds = array<i64: 2, 32>}]} {
    %c0 = arith.constant 0 : index
    %c0_0 = arith.constant 0 : index
    %0 = vector.load %arg1[%c0, %c0_0] : memref<2x32xf32, #tpu.memory_space<vmem>>, vector<2x32xf32>
    %c0_1 = arith.constant 0 : index
    %c0_2 = arith.constant 0 : index
    %c0_3 = arith.constant 0 : index
    %1 = vector.load %arg2[%c0_1, %c0_2, %c0_3] : memref<2x8x32xf32, #tpu.memory_space<vmem>>, vector<2x8x32xf32>
    %c0_4 = arith.constant 0 : index
    %c0_5 = arith.constant 0 : index
    %2 = vector.load %arg3[%c0_4, %c0_5] : memref<2x32xf32, #tpu.memory_space<vmem>>, vector<2x32xf32>
    %3 = vector.shape_cast %2 : vector<2x32xf32> to vector<2x1x32xf32>
    %4 = vector.broadcast %3 : vector<2x1x32xf32> to vector<2x8x32xf32>
    %5 = arith.subf %4, %1 : vector<2x8x32xf32>
    %6 = vector.shape_cast %5 : vector<2x8x32xf32> to vector<16x32xf32>
    %c0_6 = arith.constant 0 : index
    %c0_7 = arith.constant 0 : index
    %7 = vector.load %arg6[%c0_6, %c0_7] : memref<32x32xf32, #tpu.memory_space<vmem>>, vector<32x32xf32>
    %cst = arith.constant dense<0.000000e+00> : vector<16x32xf32>
    %8 = tpu.matmul %6, %7, %cst {dimension_numbers = #tpu.dot_dimension_numbers<[1], [0], [0], [1], [0, 0, 1, 1], [], []>} : vector<16x32xf32>, vector<32x32xf32>, vector<16x32xf32> -> vector<16x32xf32>
    %c0_8 = arith.constant 0 : index
    %c0_9 = arith.constant 0 : index
    %9 = vector.load %arg7[%c0_8, %c0_9] : memref<1x32xf32, #tpu.memory_space<vmem>>, vector<1x32xf32>
    %10 = vector.broadcast %9 : vector<1x32xf32> to vector<16x32xf32>
    %11 = arith.addf %8, %10 : vector<16x32xf32>
    %c0_10 = arith.constant 0 : index
    %c0_11 = arith.constant 0 : index
    %12 = vector.load %arg4[%c0_10, %c0_11] : memref<32x32xf32, #tpu.memory_space<vmem>>, vector<32x32xf32>
    %cst_12 = arith.constant dense<0.000000e+00> : vector<2x32xf32>
    %13 = tpu.matmul %0, %12, %cst_12 {dimension_numbers = #tpu.dot_dimension_numbers<[1], [0], [0], [1], [0, 0, 1, 1], [], []>} : vector<2x32xf32>, vector<32x32xf32>, vector<2x32xf32> -> vector<2x32xf32>
    %c0_13 = arith.constant 0 : index
    %c0_14 = arith.constant 0 : index
    %14 = vector.load %arg5[%c0_13, %c0_14] : memref<1x32xf32, #tpu.memory_space<vmem>>, vector<1x32xf32>
    %15 = vector.broadcast %14 : vector<1x32xf32> to vector<2x32xf32>
    %16 = arith.addf %13, %15 : vector<2x32xf32>
    %17 = vector.shape_cast %11 : vector<16x32xf32> to vector<2x8x32xf32>
    %18 = vector.shape_cast %16 : vector<2x32xf32> to vector<2x1x32xf32>
    %19 = vector.broadcast %18 : vector<2x1x32xf32> to vector<2x8x32xf32>
    %20 = arith.addf %17, %19 : vector<2x8x32xf32>
    %21 = math.tanh %20 : vector<2x8x32xf32>
    %c0_15 = arith.constant 0 : index
    %c0_16 = arith.constant 0 : index
    %22 = vector.load %arg8[%c0_15, %c0_16] : memref<1x32xf32, #tpu.memory_space<vmem>>, vector<1x32xf32>
    %23 = vector.shape_cast %22 : vector<1x32xf32> to vector<1x1x32xf32>
    %24 = vector.broadcast %23 : vector<1x1x32xf32> to vector<2x8x32xf32>
    %25 = arith.mulf %21, %24 : vector<2x8x32xf32>
    %cst_17 = arith.constant dense<0.000000e+00> : vector<2x8xf32>
    %26 = vector.multi_reduction <add>, %25, %cst_17 [2] : vector<2x8x32xf32> to vector<2x8xf32>
    %c0_18 = arith.constant 0 : index
    %27 = memref.load %arg9[%c0_18] : memref<1xf32, #tpu.memory_space<smem>>
    %28 = vector.broadcast %27 : f32 to vector<2x8xf32>
    %29 = arith.addf %26, %28 : vector<2x8xf32>
    %cst_19 = arith.constant dense<0xFF800000> : vector<2xf32>
    %30 = vector.multi_reduction <maximumf>, %29, %cst_19 [1] : vector<2x8xf32> to vector<2xf32>
    %31 = vector.shape_cast %30 : vector<2xf32> to vector<2x1xf32>
    %32 = vector.broadcast %31 : vector<2x1xf32> to vector<2x8xf32>
    %33 = arith.subf %29, %32 : vector<2x8xf32>
    %34 = math.exp %33 : vector<2x8xf32>
    %cst_20 = arith.constant dense<0.000000e+00> : vector<2xf32>
    %35 = vector.multi_reduction <add>, %34, %cst_20 [1] : vector<2x8xf32> to vector<2xf32>
    %36 = vector.shape_cast %35 : vector<2xf32> to vector<2x1xf32>
    %37 = tpu.reciprocal %36 {approx = true} : vector<2x1xf32> -> vector<2x1xf32>
    %38 = vector.broadcast %37 : vector<2x1xf32> to vector<2x8xf32>
    %39 = arith.mulf %34, %38 : vector<2x8xf32>
    %40 = vector.shape_cast %39 : vector<2x8xf32> to vector<2x8x1xf32>
    %41 = vector.broadcast %40 : vector<2x8x1xf32> to vector<2x8x32xf32>
    %42 = arith.mulf %41, %5 : vector<2x8x32xf32>
    %cst_21 = arith.constant dense<0.000000e+00> : vector<2x32xf32>
    %43 = vector.multi_reduction <add>, %42, %cst_21 [1] : vector<2x8x32xf32> to vector<2x32xf32>
    %c0_22 = arith.constant 0 : index
    %c0_23 = arith.constant 0 : index
    %44 = vector.load %arg10[%c0_22, %c0_23] : memref<2x32xf32, #tpu.memory_space<vmem>>, vector<2x32xf32>
    tpu.vector_store %arg10[%c0_22, %c0_23], %43 {strides = array<i32>} : memref<2x32xf32, #tpu.memory_space<vmem>>, vector<2x32xf32>,
    return
  }
  func.func @transform_0(%arg0: i32) -> (i32, i32) {
    %c0_i32 = arith.constant 0 : i32
    %c0_i32_0 = arith.constant 0 : i32
    return %arg0, %c0_i32 : i32, i32
  }
  func.func @transform_1(%arg0: i32) -> (i32, i32, i32) {
    %c0_i32 = arith.constant 0 : i32
    %c0_i32_0 = arith.constant 0 : i32
    %c0_i32_1 = arith.constant 0 : i32
    return %arg0, %c0_i32, %c0_i32_0 : i32, i32, i32
  }
  func.func @transform_2(%arg0: i32) -> (i32, i32) {
    %c0_i32 = arith.constant 0 : i32
    %c0_i32_0 = arith.constant 0 : i32
    return %arg0, %c0_i32 : i32, i32
  }
  func.func @transform_3(%arg0: i32) -> (i32, i32) {
    %c0_i32 = arith.constant 0 : i32
    %c0_i32_0 = arith.constant 0 : i32
    %c0_i32_1 = arith.constant 0 : i32
    return %c0_i32, %c0_i32_0 : i32, i32
  }
  func.func @transform_4(%arg0: i32) -> (i32, i32) {
    %c0_i32 = arith.constant 0 : i32
    %c0_i32_0 = arith.constant 0 : i32
    %c0_i32_1 = arith.constant 0 : i32
    return %c0_i32, %c0_i32_0 : i32, i32
  }
  func.func @transform_5(%arg0: i32) -> (i32, i32) {
    %c0_i32 = arith.constant 0 : i32
    %c0_i32_0 = arith.constant 0 : i32
    %c0_i32_1 = arith.constant 0 : i32
    return %c0_i32, %c0_i32_0 : i32, i32
  }
  func.func @transform_6(%arg0: i32) -> (i32, i32) {
    %c0_i32 = arith.constant 0 : i32
    %c0_i32_0 = arith.constant 0 : i32
    %c0_i32_1 = arith.constant 0 : i32
    return %c0_i32, %c0_i32_0 : i32, i32
  }
  func.func @transform_7(%arg0: i32) -> (i32, i32) {
    %c0_i32 = arith.constant 0 : i32
    %c0_i32_0 = arith.constant 0 : i32
    %c0_i32_1 = arith.constant 0 : i32
    return %c0_i32, %c0_i32_0 : i32, i32
  }
  func.func @transform_8(%arg0: i32) -> i32 {
    %c0_i32 = arith.constant 0 : i32
    %c0_i32_0 = arith.constant 0 : i32
    return %c0_i32 : i32
  }
  func.func @transform_9(%arg0: i32) -> (i32, i32) {
    %c0_i32 = arith.constant 0 : i32
    %c0_i32_0 = arith.constant 0 : i32
    return %arg0, %c0_i32 : i32, i32
  }
}

</mosaic_0001>

<bundles_post_ra>
// kernel: tpu_custom_call.1
= control target key start
LH: loop header
LB: loop body
LE: loop exit
PB: predicated region body
PF: predicated region fallthrough
CT: control target
= control target key end

     0   :  { %15 = vsyncpa [#allocation4], 0  ;;  %s816_s0 = inlined_call_operand.vmem [shape: f32[2,32], index: 0, kind: input, shape index: {}]   ;;  %s817_s1 = inlined_call_operand.hbm [shape: f32[2,8,32], index: 1, kind: input, shape index: {}]   ;;  %s818_s2 = inlined_call_operand.vmem [shape: f32[2,32], index: 2, kind: input, shape index: {}]   ;;  %s819_s3 = inlined_call_operand.hbm [shape: f32[32,32], index: 3, kind: input, shape index: {}]   ;;  %s820_s4 = inlined_call_operand.vmem [shape: f32[1,32], index: 4, kind: input, shape index: {}]   ;;  %s821_s5 = inlined_call_operand.hbm [shape: f32[32,32], index: 5, kind: input, shape index: {}]   ;;  %s822_s6 = inlined_call_operand.vmem [shape: f32[1,32], index: 6, kind: input, shape index: {}]   ;;  %s823_s7 = inlined_call_operand.vmem [shape: f32[1,32], index: 7, kind: input, shape index: {}]   ;;  %s824_s8 = inlined_call_operand.<no memory space> [shape: f32[1], index: 8, kind: input, shape index: {}]   ;;  %s825_s9 = inlined_call_operand.hbm [shape: f32[2,32], index: 9, kind: output, shape index: {}]  }
   0x1   :  { %16 = vsyncpa [#allocation7], 0 }
   0x2   :  { %17 = vsyncpa [#allocation5], 0  ;;  %s637_s30 = smov [#allocation6]   ;;  %s638_s11 = smov [#allocation3]  }
   0x3   :  { %s39_s10 = sshll.u32 %s637_s30, 4  ;;  %s25_s12 = sshll.u32 %s638_s11, 4  ;;  %s40_s10 = int_to_ptr.vmem [resolvable:$true] %s39_s10  ;;  %s698_s12 = int_to_ptr.vmem [resolvable:$true] %s25_s12 }
   0x4   :  { %s543_s15 = scalar_lea.hbm %s819_s3, 512 }
   0x5   :  { %p544_p0 = scmp.ne.s32.totalorder %s819_s3, %s543_s15  ;;  %p547_p1 = scmp.lt.u32.totalorder %s543_s15, %s819_s3 }
   0x7   :  { %p549_p2 = pnand %p547_p1, %p544_p0 }
   0x9   :  { %552 = shalt.err (!%p549_p2)
}
   0xa   :  { %s553_s20 = scalar_lea.vmem %s40_s10, 512  ;;  %p558_p4 = scmp.lt.s32.totalorder %s40_s10, %s40_s10 }
   0xb   :  { %p554_p3 = scmp.ne.s32.totalorder %s40_s10, %s553_s20  ;;  %p559_p5 = scmp.lt.s32.totalorder %s553_s20, %s553_s20 }
   0xd   :  { %p560_p6 = por %p559_p5, %p558_p4 }
   0xf   :  { %p561_p7 = pnand %p560_p6, %p554_p3 }
  0x11   :  { %564 = shalt.err (!%p561_p7)
}
  0x12   :  { %s639_s21 = smov 128   ;;  %s640_s22 = smov 8  }
  0x13   :  { %45 = dma.hbm_to_vmem [thread:$0]  %s819_s3, 512, %s40_s10, [#allocation7], %s639_s21, %s639_s21, %s640_s22  }
  0x14   :  { %s565_s27 = scalar_lea.hbm %s817_s1, 256 }
  0x15   :  { %p566_p8 = scmp.ne.s32.totalorder %s817_s1, %s565_s27  ;;  %p569_p9 = scmp.lt.u32.totalorder %s565_s27, %s817_s1 }
  0x17   :  { %p571_p10 = pnand %p569_p9, %p566_p8 }
  0x19   :  { %574 = shalt.err (!%p571_p10)
}
  0x1a   :  { %s575_s13 = scalar_lea.vmem %s698_s12, 256  ;;  %p580_p12 = scmp.lt.s32.totalorder %s698_s12, %s698_s12 }
  0x1b   :  { %p576_p11 = scmp.ne.s32.totalorder %s698_s12, %s575_s13  ;;  %p581_p13 = scmp.lt.s32.totalorder %s575_s13, %s575_s13 }
  0x1d   :  { %p582_p0 = por %p581_p13, %p580_p12 }
  0x1f   :  { %p583_p1 = pnand %p582_p0, %p576_p11 }
  0x21   :  { %586 = shalt.err (!%p583_p1)
}
  0x22   :  { %31 = dma.hbm_to_vmem [thread:$0]  %s817_s1, 256, %s698_s12, [#allocation4], %s639_s21, %s639_s21, %s640_s22  }
  0x23   :  { %s641_s14 = smov [#allocation8]   ;;  %s587_s18 = scalar_lea.hbm %s821_s5, 512 }
  0x24   :  { %s53_s15 = sshll.u32 %s641_s14, 4  ;;  %p588_p2 = scmp.ne.s32.totalorder %s821_s5, %s587_s18  ;;  %s54_s15 = int_to_ptr.vmem [resolvable:$true] %s53_s15 }
  0x25   :  { %p591_p3 = scmp.lt.u32.totalorder %s587_s18, %s821_s5 }
  0x27   :  { %p593_p4 = pnand %p591_p3, %p588_p2 }
  0x29   :  { %596 = shalt.err (!%p593_p4)
}
  0x2a   :  { %s597_s25 = scalar_lea.vmem %s54_s15, 512  ;;  %p602_p6 = scmp.lt.s32.totalorder %s54_s15, %s54_s15 }
  0x2b   :  { %p598_p5 = scmp.ne.s32.totalorder %s54_s15, %s597_s25  ;;  %p603_p7 = scmp.lt.s32.totalorder %s597_s25, %s597_s25 }
  0x2d   :  { %p604_p8 = por %p603_p7, %p602_p6 }
  0x2f   :  { %p605_p9 = pnand %p604_p8, %p598_p5 }
  0x31   :  { %608 = shalt.err (!%p605_p9)
}
  0x32   :  { %59 = dma.hbm_to_vmem [thread:$0]  %s821_s5, 512, %s54_s15, [#allocation7], %s639_s21, %s639_s21, %s640_s22  }
  0x33   :  { %631 = dma.done.wait [#allocation4], 256  }
  0x34   :  { %632 = vsyncadd [#allocation4], 4294967040 }
  0x35   :  { %633 = dma.done.wait [#allocation7], 1024  }
  0x36   :  { %634 = vsyncadd [#allocation7], 4294966272  ;;  %v642_v0 = vmov 0.0|0.0   ;;  %vm643_vm0 = vmmov 0   ;;  %v644_v1 = vmov 0.0   ;;  %v91_v2 = vlaneseq  ;;  %v207_v7 = vld [vmem:[#allocation6] sm:$0xff] }
  0x37   :  { %514 = vmatprep.subr.bf16.mxu1 %v642_v0  ;;  %503 = vmatprep.mubr.msk.f32.mxu1 %vm643_vm0, %v644_v1  ;;  %v645_v3 = vmov 1966171168   ;;  %v208_v8 = vld [vmem:[#allocation6 + $0x8] sm:$0xff]  ;;  %v114_v9 = vld [vmem:[#allocation8] sm:$0xff]  ;;  %v209_v13 = vld [vmem:[#allocation6 + $0x10] sm:$0xff]  ;;  %vm125_vm1 = vcmask 261120   ;;  %v344_v57 = vstv %s824_s8 }
  0x38   :  { %v89_v4 = vunpack.c.l.s4 %v645_v3  ;;  %v751_v5 = vshrl.u32 %v91_v2, 7  ;;  %v515_v11 = vpack.c.bf16 %v208_v8, %v207_v7  ;;  %v115_v12 = vld [vmem:[#allocation8 + $0x8] sm:$0xff]  ;;  %v210_v14 = vld [vmem:[#allocation6 + $0x18] sm:$0xff]  ;;  %v116_v16 = vld [vmem:[#allocation8 + $0x10] sm:$0xff]  ;;  %v350_v56 = vand.u32 127, %v91_v2 }
  0x39   :  { %v506_v15 = vpack.c.bf16 %v115_v12, %v114_v9  ;;  %v117_v17 = vld [vmem:[#allocation8 + $0x18] sm:$0xff]  ;;  %v518_v19 = vpack.c.bf16 %v210_v14, %v209_v13  ;;  %v466_v21 = vld.sshfl [vmem:[%s818_s2] sm:$0x11 pattern:$0x75316420]  ;;  %vm359_vm2 = vcmask 1041409  }
  0x3a   :  { %v90_v6 = vunpack.c.0.s8 %v89_v4  ;;  %v755_v18 = vsub.s32 0, %v751_v5  ;;  %516 = vmatpush3.bf16.msra.mxu1 %v515_v11  ;;  %v510_v20 = vpack.c.bf16 %v117_v17, %v116_v16  ;;  %v87_v22 = vcombine.high %v466_v21, %v466_v21  ;;  %v76_v24 = vld [vmem:[#allocation3] sm:$0xff]  ;;  %v77_v28 = vld [vmem:[#allocation3 + $0x8] sm:$0xff] }
  0x3b   :  { %507 = vmatprep.subr.bf16.mxu0 %v506_v15  ;;  %517 = vmatprep.subr.bf16.mxu1 %v642_v0  ;;  %v75_v27 = vld [vmem:[%s816_s0] sm:$0x3]  ;;  %v353_v59 = vsub.s32 %v350_v56, %v751_v5  ;;  %vm362_vm3 = vcmask 58368   ;;  %v646_v2 = vmov 0   ;;  %v373_v4 = vsub.s32 1, %v751_v5 }
  0x3c   :  { %v93_v10 = vsub.s32 %v90_v6, %v751_v5  ;;  %509 = vmatpush3.bf16.msra.mxu0 %v506_v15  ;;  %v470_v32 = vld [vmem:[%s820_s4] ss:$0 sm:$0xff]  ;;  %532 = vset.pattern.permute.xlu0 %v646_v2  ;;  %vm448_vm4 = vcmask 254976  }
  0x3d   :  { %511 = vmatprep.subr.bf16.mxu0 %v510_v20  ;;  %v467_v37 = vld [vmem:[%s822_s6] ss:$0 sm:$0xff]  ;;  %531 = vset.pattern.permute.xlu1 %v646_v2 }
  0x3e   :  { %v94_v23 = vrot.slane %v466_v21, %v93_v10  ;;  %v101_v25 = vrot.slane %v87_v22, %v93_v10  ;;  %519 = vmatpush3.bf16.msra.mxu1 %v518_v19  ;;  %v472_v49 = vld [vmem:[%s823_s7] ss:$0 sm:$0xff]  ;;  %s647_s7 = smov [#allocation9]  }
  0x3f   :  { %s456_s8 = sshll.u32 %s647_s7, 4  ;;  %s457_s8 = int_to_ptr.vmem [resolvable:$true] %s456_s8 }
  0x40   :  { %v105_v26 = vrot.slane %v94_v23, %v755_v18  ;;  %v109_v30 = vrot.slane %v101_v25, %v755_v18  ;;  %513 = vmatpush3.bf16.msra.mxu0 %v510_v20  ;;  %s609_s11 = scalar_lea.vmem %s457_s8, 32  ;;  %p614_p11 = scmp.lt.s32.totalorder %s457_s8, %s457_s8 }
  0x41   :  { %504 = vmatmul.mubr.msk.f32.vlgmr.msra.gmra.mrb[0].mxu1 %vm125_vm1, %v75_v27  ;;  %p610_p10 = scmp.ne.s32.totalorder %s457_s8, %s609_s11  ;;  %p615_p12 = scmp.lt.s32.totalorder %s609_s11, %s609_s11 }
  0x42   :  { %v764_v29 = vsub.f32 %v105_v26, %v76_v24  ;;  %v770_v31 = vsub.f32 %v109_v30, %v77_v28 }
  0x43   :  { %p616_p13 = por %p615_p12, %p614_p11 }
  0x44   :  { %492 = vmatprep.mubr.msk.f32.mxu0 %vm125_vm1, %v764_v29 }
  0x45   :  { %493 = vmatmul.mubr.msk.f32.vlgmr.msra.gmra.mrb[0].mxu0 %vm125_vm1, %v770_v31  ;;  %p617_p0 = pnand %p616_p13, %p610_p10 }
 0x114   :  { %v287_v33 = vpop.f32.mrb[0].mxu1 }
 0x115   :  { %v288_v34 = vadd.f32 %v470_v32, %v287_v33  ;;  %v505_v35 = vpop.f32.mrb[1].mxu1 }
 0x117   :  { %v298_v38 = vrot.slane %v288_v34, %v93_v10 }
 0x118   :  { %v494_v36 = vpop.f32.mrb[0].mxu0 }
 0x119   :  { %v198_v39 = vpop.f32.mrb[1].mxu0  ;;  %v299_v40 = vcombine.high %v298_v38, %v298_v38  ;;  %v306_v41 = vrot.slane %v298_v38, %v93_v10  ;;  %v204_v45 = vadd.f32 %v494_v36, %v467_v37 }
 0x11a   :  { %v199_v42 = vadd.f32 %v467_v37, %v198_v39 }
 0x11b   :  { %v313_v43 = vrot.slane %v299_v40, %v93_v10  ;;  %v317_v44 = vrot.slane %v306_v41, %v755_v18 }
 0x11d   :  { %v321_v46 = vrot.slane %v313_v43, %v755_v18  ;;  %v324_v47 = vadd.f32 %v317_v44, %v199_v42 }
 0x11f   :  { %v325_v48 = vadd.f32 %v321_v46, %v204_v45  ;;  %533 = vtanh.f32 %v324_v47 }
 0x121   :  { %535 = vtanh.f32 %v325_v48 }
 0x129   :  { %v534_v50 = vpop.eup %533 }
 0x12a   :  { %v335_v51 = vmul.f32 %v534_v50, %v472_v49 }
 0x12b   :  { %v536_v52 = vpop.eup %535 }
 0x12c   :  { %v337_v53 = vsel %vm125_vm1, %v335_v51, 0.0  ;;  %v336_v54 = vmul.f32 %v536_v52, %v472_v49 }
 0x12d   :  { %338 = vadd.xlane.f32.xlu0 %v337_v53 }
 0x12e   :  { %v340_v55 = vsel %vm125_vm1, %v336_v54, 0.0 }
 0x131   :  { %341 = vadd.xlane.f32.xlu0 %v340_v55 }
 0x1ba   :  { %v339_v58 = vpop.xlane.xlu0 %338 }
 0x1bb   :  { %v345_v60 = vadd.f32 %v344_v57, %v339_v58 }
 0x1bd   :  { %v354_v63 = vrot.slane %v345_v60, %v353_v59 }
 0x1be   :  { %v342_v61 = vpop.xlane.xlu0 %341 }
 0x1bf   :  { %v346_v62 = vadd.f32 %v344_v57, %v342_v61 }
 0x1c1   :  { %v358_v0 = vrot.slane %v346_v62, %v353_v59 }
 0x1c3   :  { %v360_v1 = vsel %vm359_vm2, %v358_v0, %v354_v63 }
 0x1c4   :  { %v363_v3 = vsel %vm362_vm3, %v360_v1, -inf }
 0x1c5   :  { %364 = vmax.xlane.f32.xlu1 %v363_v3 }
 0x252   :  { %v365_v6 = vpop.xlane.xlu1 %364 }
 0x253   :  { %v370_v7 = vrot.slane %v365_v6, %v755_v18  ;;  %v374_v8 = vrot.slane %v365_v6, %v373_v4 }
 0x255   :  { %v377_v9 = vsub.f32 %v345_v60, %v370_v7  ;;  %v378_v10 = vsub.f32 %v346_v62, %v374_v8 }
 0x257   :  { %v379_v11 = vmul.f32 1.442695, %v377_v9  ;;  %v381_v12 = vmul.f32 1.442695, %v378_v10 }
 0x259   :  { %537 = vpow2.f32 %v379_v11 }
 0x25a   :  { %539 = vpow2.f32 %v381_v12 }
 0x263   :  { %v538_v13 = vpop.eup %537 }
 0x264   :  { %v540_v14 = vpop.eup %539  ;;  %386 = vperm.xlu1 %531, %v538_v13  }
 0x265   :  { %389 = vperm.xlu0 %532, %v540_v14  }
 0x2e3   :  { %v387_v15 = vpop.permute.xlu1 %386 }
 0x2e4   :  { %v390_v16 = vpop.permute.xlu0 %389  ;;  %v394_v17 = vrot.slane %v387_v15, %v353_v59 }
 0x2e5   :  { %v398_v19 = vrot.slane %v390_v16, %v353_v59 }
 0x2e7   :  { %v399_v5 = vsel %vm359_vm2, %v398_v19, %v394_v17 }
 0x2e8   :  { %v401_v20 = vsel %vm362_vm3, %v399_v5, 0.0 }
 0x2e9   :  { %402 = vadd.xlane.f32.xlu1 %v401_v20 }
 0x376   :  { %v403_v21 = vpop.xlane.xlu1 %402 }
 0x377   :  { %541 = vrcp.f32 %v403_v21 }
 0x381   :  { %v542_v22 = vpop.eup %541 }
 0x382   :  { %v409_v23 = vrot.slane %v542_v22, %v755_v18  ;;  %v413_v25 = vrot.slane %v542_v22, %v373_v4 }
 0x384   :  { %v416_v24 = vmul.f32 %v538_v13, %v409_v23  ;;  %v417_v26 = vmul.f32 %v540_v14, %v413_v25 }
 0x386   :  { %420 = vperm.xlu0 %532, %v416_v24  }
 0x38a   :  { %425 = vperm.xlu0 %532, %v417_v26  }
 0x405   :  { %v421_v27 = vpop.permute.xlu0 %420 }
 0x406   :  { %v428_v28 = vmul.f32 %v421_v27, %v764_v29 }
 0x408   :  { %v430_v30 = vsel %vm125_vm1, %v428_v28, 0.0 }
 0x409   :  { %v431_v32 = vrot.slane %v430_v30, 4  ;;  %v426_v33 = vpop.permute.xlu0 %425 }
 0x40a   :  { %v429_v34 = vmul.f32 %v426_v33, %v770_v31 }
 0x40b   :  { %v432_v35 = vadd.f32 %v431_v32, %v430_v30 }
 0x40c   :  { %v437_v36 = vsel %vm125_vm1, %v429_v34, 0.0 }
 0x40d   :  { %v433_v37 = vrot.slane %v432_v35, 2  ;;  %v438_v38 = vrot.slane %v437_v36, 4 }
 0x40f   :  { %v434_v18 = vadd.f32 %v433_v37, %v432_v35  ;;  %v439_v39 = vadd.f32 %v438_v38, %v437_v36 }
 0x411   :  { %v440_v40 = vrot.slane %v439_v39, 2  ;;  %v435_v41 = vrot.slane %v434_v18, 1 }
 0x413   :  { %v441_v42 = vadd.f32 %v440_v40, %v439_v39  ;;  %v436_v29 = vadd.f32 %v435_v41, %v434_v18 }
 0x415   :  { %v442_v43 = vrot.slane %v441_v42, 1 }
 0x417   :  { %v443_v44 = vadd.f32 %v442_v43, %v441_v42 }
 0x419   :  { %v446_v45 = vsel %vm359_vm2, %v443_v44, %v436_v29 }
 0x41a   :  { %449 = vst.msk [vmem:[#allocation9] sm:$0x3] %vm448_vm4, %v446_v45 }
 0x41b   :  { %620 = shalt.err (!%p617_p0)
}
 0x41c   :  { %s621_s10 = scalar_lea.hbm %s825_s9, 32 }
 0x41d   :  { %p622_p1 = scmp.ne.s32.totalorder %s825_s9, %s621_s10  ;;  %p625_p2 = scmp.lt.u32.totalorder %s621_s10, %s825_s9 }
 0x41f   :  { %p627_p3 = pnand %p625_p2, %p622_p1 }
 0x421   :  { %630 = shalt.err (!%p627_p3)
}
 0x422   :  { %459 = dma.vmem_to_hbm [thread:$0]  %s457_s8, 32, %s825_s9, [#allocation5]  }
 0x423   :  { %635 = dma.done.wait [#allocation5], 32  }
 0x424   :  { %636 = vsyncadd [#allocation5], 4294967264 }
 0x425   :  { %463 = vsyncpa [#allocation4], 1 }
 0x426   :  { %464 = vsyncpa [#allocation7], 1 }
 0x427   :  { %465 = vsyncpa [#allocation5], 1 }

</bundles_post_ra>
